<compile_context>
chip_gen: v6e
topology: v6e:2x2x1
jax: 0.10.0
libtpu: 0.0.40
codegen_flags: <defaults>
</compile_context>

<pallas_src>
import math

import jax
import jax.numpy as jnp
from jax.experimental import pallas as pl
from jax.experimental.pallas import tpu as pltpu


def _round_up(x: int, m: int) -> int:
    return ((x + m - 1) // m) * m


def self_attention(x, wq, bq, wk, bk, wv, bv, *, tq: int = 128, tk: int = 128):
    """Single-head self attention.

    x : (seq, input_dim) float32
    w*: (input_dim, hidden_dim) float32   (PyTorch weight already transposed)
    b*: (1, hidden_dim) float32
    returns (seq, hidden_dim) float32
    """
    seq, d_in = x.shape
    hidden = wq.shape[1]
    scale = 1.0 / math.sqrt(float(hidden))  # true hidden_dim, not padded

    # ---- pad to lane/sublane friendly shapes -------------------------------
    d_in_p = _round_up(d_in, 128)
    h_p = _round_up(hidden, 128)
    seq_p = _round_up(seq, math.lcm(tq, tk))
    n_q = seq_p // tq
    n_kv = seq_p // tk
    mask_needed = seq_p != seq  # padded kv rows must be masked out of softmax

    f32 = jnp.float32
    x_p = jnp.pad(x, ((0, seq_p - seq), (0, d_in_p - d_in)))
    pad_w = lambda w: jnp.pad(w, ((0, d_in_p - d_in), (0, h_p - hidden)))
    pad_b = lambda b: jnp.pad(b, ((0, 0), (0, h_p - hidden)))
    wq_p, wk_p, wv_p = pad_w(wq), pad_w(wk), pad_w(wv)
    bq_p, bk_p, bv_p = pad_b(bq), pad_b(bk), pad_b(bv)

    w_spec = pl.BlockSpec((d_in_p, h_p), lambda *_: (0, 0))   # resident weights
    b_spec = pl.BlockSpec((1, h_p), lambda *_: (0, 0))        # resident biases

    # ---- kernel 1: K/V projection (Q is fused into the attention kernel) ---
    def _kv_proj_kernel(x_ref, wk_ref, bk_ref, wv_ref, bv_ref, k_ref, v_ref):
        xt = x_ref[...]
        k = jnp.dot(xt, wk_ref[...], preferred_element_type=f32) + bk_ref[...]
        k_ref[...] = k.astype(k_ref.dtype)
        v = jnp.dot(xt, wv_ref[...], preferred_element_type=f32) + bv_ref[...]
        v_ref[...] = v.astype(v_ref.dtype)

    proj_cost = pl.CostEstimate(
        flops=2 * 2 * seq_p * d_in_p * h_p,
        transcendentals=0,
        bytes_accessed=4 * (seq_p * d_in_p + 2 * (d_in_p * h_p + h_p)
                            + 2 * seq_p * h_p),
    )

    k_p, v_p = pl.pallas_call(
        _kv_proj_kernel,
        grid=(seq_p // tk,),
        in_specs=[
            pl.BlockSpec((tk, d_in_p), lambda i: (i, 0)),
            w_spec, b_spec, w_spec, b_spec,
        ],
        out_specs=(
            pl.BlockSpec((tk, h_p), lambda i: (i, 0)),
            pl.BlockSpec((tk, h_p), lambda i: (i, 0)),
        ),
        out_shape=(
            jax.ShapeDtypeStruct((seq_p, h_p), f32),
            jax.ShapeDtypeStruct((seq_p, h_p), f32),
        ),
        compiler_params=pltpu.CompilerParams(
            dimension_semantics=("parallel",),
            vmem_limit_bytes=32 * 1024 * 1024,
        ),
        cost_estimate=proj_cost,
    )(x_p, wk_p, bk_p, wv_p, bv_p)

    # ---- kernel 2: flash attention with fused Q projection ------------------
    def _flash_kernel(xq_ref, wq_ref, bq_ref, k_ref, v_ref, o_ref,
                      q_scr, m_scr, l_scr, acc_scr):
        j = pl.program_id(1)

        @pl.when(j == 0)
        def _init():
            # Q for this q-tile is computed exactly once and held in VMEM
            # scratch for all kv steps; the softmax scale is folded in here
            # (O(tq*h) multiplies instead of O(tq*seq)).
            q = (jnp.dot(xq_ref[...], wq_ref[...],
                         preferred_element_type=f32) + bq_ref[...])
            q_scr[...] = q * f32(scale)
            m_scr[...] = jnp.full_like(m_scr, -jnp.inf)
            l_scr[...] = jnp.zeros_like(l_scr)
            acc_scr[...] = jnp.zeros_like(acc_scr)

        # Contract the last dim of both Q and K -> no explicit K transpose.
        s = jax.lax.dot_general(
            q_scr[...], k_ref[...],
            dimension_numbers=(((1,), (1,)), ((), ())),
            preferred_element_type=f32,
        )
        if mask_needed:
            kv_ids = j * tk + jax.lax.broadcasted_iota(jnp.int32, s.shape, 1)
            s = jnp.where(kv_ids < seq, s, -jnp.inf)

        m_prev = m_scr[...]
        m_new = jnp.maximum(m_prev, jnp.max(s, axis=-1, keepdims=True))
        alpha = jnp.exp(m_prev - m_new)
        p = jnp.exp(s - m_new)
        l_scr[...] = alpha * l_scr[...] + jnp.sum(p, axis=-1, keepdims=True)
        acc_scr[...] = alpha * acc_scr[...] + jnp.dot(
            p.astype(v_ref.dtype), v_ref[...], preferred_element_type=f32)
        m_scr[...] = m_new

        @pl.when(j == pl.num_programs(1) - 1)
        def _finalize():
            # Normalization deferred to the (tq, h) accumulator: one
            # reciprocal + multiply per output tile instead of per score.
            # (approx=True moves it to the EUP at ~1e-4 relative error.)
            inv_l = pl.reciprocal(l_scr[...], approx=False)
            o_ref[...] = (acc_scr[...] * inv_l).astype(o_ref.dtype)

    attn_cost = pl.CostEstimate(
        flops=2 * seq_p * d_in_p * h_p + 4 * seq_p * seq_p * h_p,
        transcendentals=seq_p * seq_p,
        bytes_accessed=4 * (seq_p * d_in_p + d_in_p * h_p + h_p
                            + 2 * n_q * seq_p * h_p + seq_p * h_p),
    )

    out_p = pl.pallas_call(
        _flash_kernel,
        grid=(n_q, n_kv),
        in_specs=[
            pl.BlockSpec((tq, d_in_p), lambda i, j: (i, 0)),  # x q-tile
            w_spec,                                           # Wq (resident)
            b_spec,                                           # bq (resident)
            pl.BlockSpec((tk, h_p), lambda i, j: (j, 0)),     # K kv-tile
            pl.BlockSpec((tk, h_p), lambda i, j: (j, 0)),     # V kv-tile
        ],
        out_specs=pl.BlockSpec((tq, h_p), lambda i, j: (i, 0)),
        out_shape=jax.ShapeDtypeStruct((seq_p, h_p), f32),
        scratch_shapes=[
            pltpu.VMEM((tq, h_p), f32),  # Q tile (scaled), computed at j==0
            pltpu.VMEM((tq, 1), f32),    # running max
            pltpu.VMEM((tq, 1), f32),    # running denominator
            pltpu.VMEM((tq, h_p), f32),  # un-normalized output accumulator
        ],
        compiler_params=pltpu.CompilerParams(
            dimension_semantics=("parallel", "arbitrary"),
            vmem_limit_bytes=32 * 1024 * 1024,
        ),
        cost_estimate=attn_cost,
    )(x_p, wq_p, bq_p, k_p, v_p)

    return out_p[:seq, :hidden]


def _ref_self_attention(x, wq, bq, wk, bk, wv, bv):
    q = x @ wq + bq
    k = x @ wk + bk
    v = x @ wv + bv
    hidden_dim = wq.shape[1]
    s = (q @ k.T) / jnp.sqrt(jnp.float32(hidden_dim))
    a = jax.nn.softmax(s, axis=-1)
    return a @ v


if __name__ == "__main__":
    # Small shapes consistent with the module. seq is deliberately NOT a
    # multiple of the tile size so both the multi-tile grid and the kv padding
    # mask are exercised.
    seq, input_dim, hidden_dim = 200, 16, 32

    key = jax.random.PRNGKey(0)
    kx, kq, kbq, kk, kbk, kv, kbv = jax.random.split(key, 7)

    x = jax.random.normal(kx, (seq, input_dim), dtype=jnp.float32)

    # PyTorch nn.Linear init bound; weights stored pre-transposed
    # (input_dim, hidden_dim) == PyTorch W^T, so the kernel does x @ W.
    bound = 1.0 / math.sqrt(float(input_dim))
    wq = jax.random.uniform(kq, (input_dim, hidden_dim), jnp.float32, -bound, bound)
    wk = jax.random.uniform(kk, (input_dim, hidden_dim), jnp.float32, -bound, bound)
    wv = jax.random.uniform(kv, (input_dim, hidden_dim), jnp.float32, -bound, bound)
    bq = jax.random.uniform(kbq, (1, hidden_dim), jnp.float32, -bound, bound)
    bk = jax.random.uniform(kbk, (1, hidden_dim), jnp.float32, -bound, bound)
    bv = jax.random.uniform(kbv, (1, hidden_dim), jnp.float32, -bound, bound)

    out = self_attention(x, wq, bq, wk, bk, wv, bv)
    out = jax.block_until_ready(out)

    ref = _ref_self_attention(x, wq, bq, wk, bk, wv, bv)
    assert out.shape == (seq, hidden_dim)
    assert jnp.allclose(out, ref, atol=1e-4, rtol=1e-4), float(
        jnp.max(jnp.abs(out - ref)))

    print("KERNEL_OK")
</pallas_src>

<mosaic_0001>
module attributes {stable_mosaic.version = 11 : i64} {
  func.func @_kv_proj_kernel(%arg0: i32, %arg1: memref<128x128xf32, #tpu.memory_space<vmem>>, %arg2: memref<128x128xf32, #tpu.memory_space<vmem>>, %arg3: memref<1x128xf32, #tpu.memory_space<vmem>>, %arg4: memref<128x128xf32, #tpu.memory_space<vmem>>, %arg5: memref<1x128xf32, #tpu.memory_space<vmem>>, %arg6: memref<128x128xf32, #tpu.memory_space<vmem>>, %arg7: memref<128x128xf32, #tpu.memory_space<vmem>>) attributes {dimension_semantics = [#tpu.dimension_semantics<parallel>], iteration_bounds = array<i64: 2>, scalar_prefetch = 0 : i64, scratch_operands = 0 : i64, tpu.core_type = #tpu.core_type<tc>, window_params = [{transform_indices = @transform_0, window_bounds = array<i64: 128, 128>}, {pipeline_mode = #tpu.pipeline_mode<synchronous>, transform_indices = @transform_1, window_bounds = array<i64: 128, 128>}, {pipeline_mode = #tpu.pipeline_mode<synchronous>, transform_indices = @transform_2, window_bounds = array<i64: 1, 128>}, {pipeline_mode = #tpu.pipeline_mode<synchronous>, transform_indices = @transform_3, window_bounds = array<i64: 128, 128>}, {pipeline_mode = #tpu.pipeline_mode<synchronous>, transform_indices = @transform_4, window_bounds = array<i64: 1, 128>}, {transform_indices = @transform_5, window_bounds = array<i64: 128, 128>}, {transform_indices = @transform_6, window_bounds = array<i64: 128, 128>}]} {
    %c0 = arith.constant 0 : index
    %c0_0 = arith.constant 0 : index
    %0 = vector.load %arg1[%c0, %c0_0] : memref<128x128xf32, #tpu.memory_space<vmem>>, vector<128x128xf32>
    %c0_1 = arith.constant 0 : index
    %c0_2 = arith.constant 0 : index
    %1 = vector.load %arg2[%c0_1, %c0_2] : memref<128x128xf32, #tpu.memory_space<vmem>>, vector<128x128xf32>
    %cst = arith.constant dense<0.000000e+00> : vector<128x128xf32>
    %2 = tpu.matmul %0, %1, %cst {dimension_numbers = #tpu.dot_dimension_numbers<[1], [0], [0], [1], [0, 0, 1, 1], [], []>} : vector<128x128xf32>, vector<128x128xf32>, vector<128x128xf32> -> vector<128x128xf32>
    %c0_3 = arith.constant 0 : index
    %c0_4 = arith.constant 0 : index
    %3 = vector.load %arg3[%c0_3, %c0_4] : memref<1x128xf32, #tpu.memory_space<vmem>>, vector<1x128xf32>
    %4 = vector.broadcast %3 : vector<1x128xf32> to vector<128x128xf32>
    %5 = arith.addf %2, %4 : vector<128x128xf32>
    %c0_5 = arith.constant 0 : index
    %c0_6 = arith.constant 0 : index
    %6 = vector.load %arg6[%c0_5, %c0_6] : memref<128x128xf32, #tpu.memory_space<vmem>>, vector<128x128xf32>
    tpu.vector_store %arg6[%c0_5, %c0_6], %5 {strides = array<i32>} : memref<128x128xf32, #tpu.memory_space<vmem>>, vector<128x128xf32>,
    %c0_7 = arith.constant 0 : index
    %c0_8 = arith.constant 0 : index
    %7 = vector.load %arg4[%c0_7, %c0_8] : memref<128x128xf32, #tpu.memory_space<vmem>>, vector<128x128xf32>
    %cst_9 = arith.constant dense<0.000000e+00> : vector<128x128xf32>
    %8 = tpu.matmul %0, %7, %cst_9 {dimension_numbers = #tpu.dot_dimension_numbers<[1], [0], [0], [1], [0, 0, 1, 1], [], []>} : vector<128x128xf32>, vector<128x128xf32>, vector<128x128xf32> -> vector<128x128xf32>
    %c0_10 = arith.constant 0 : index
    %c0_11 = arith.constant 0 : index
    %9 = vector.load %arg5[%c0_10, %c0_11] : memref<1x128xf32, #tpu.memory_space<vmem>>, vector<1x128xf32>
    %10 = vector.broadcast %9 : vector<1x128xf32> to vector<128x128xf32>
    %11 = arith.addf %8, %10 : vector<128x128xf32>
    %c0_12 = arith.constant 0 : index
    %c0_13 = arith.constant 0 : index
    %12 = vector.load %arg7[%c0_12, %c0_13] : memref<128x128xf32, #tpu.memory_space<vmem>>, vector<128x128xf32>
    tpu.vector_store %arg7[%c0_12, %c0_13], %11 {strides = array<i32>} : memref<128x128xf32, #tpu.memory_space<vmem>>, vector<128x128xf32>,
    return
  }
  func.func @transform_0(%arg0: i32) -> (i32, i32) {
    %c0_i32 = arith.constant 0 : i32
    %c0_i32_0 = arith.constant 0 : i32
    return %arg0, %c0_i32 : i32, i32
  }
  func.func @transform_1(%arg0: i32) -> (i32, i32) {
    %c0_i32 = arith.constant 0 : i32
    %c0_i32_0 = arith.constant 0 : i32
    %c0_i32_1 = arith.constant 0 : i32
    return %c0_i32, %c0_i32_0 : i32, i32
  }
  func.func @transform_2(%arg0: i32) -> (i32, i32) {
    %c0_i32 = arith.constant 0 : i32
    %c0_i32_0 = arith.constant 0 : i32
    %c0_i32_1 = arith.constant 0 : i32
    return %c0_i32, %c0_i32_0 : i32, i32
  }
  func.func @transform_3(%arg0: i32) -> (i32, i32) {
    %c0_i32 = arith.constant 0 : i32
    %c0_i32_0 = arith.constant 0 : i32
    %c0_i32_1 = arith.constant 0 : i32
    return %c0_i32, %c0_i32_0 : i32, i32
  }
  func.func @transform_4(%arg0: i32) -> (i32, i32) {
    %c0_i32 = arith.constant 0 : i32
    %c0_i32_0 = arith.constant 0 : i32
    %c0_i32_1 = arith.constant 0 : i32
    return %c0_i32, %c0_i32_0 : i32, i32
  }
  func.func @transform_5(%arg0: i32) -> (i32, i32) {
    %c0_i32 = arith.constant 0 : i32
    %c0_i32_0 = arith.constant 0 : i32
    return %arg0, %c0_i32 : i32, i32
  }
  func.func @transform_6(%arg0: i32) -> (i32, i32) {
    %c0_i32 = arith.constant 0 : i32
    %c0_i32_0 = arith.constant 0 : i32
    return %arg0, %c0_i32 : i32, i32
  }
}

</mosaic_0001>

<bundles_post_ra>
// kernel: tpu_custom_call.1
= control target key start
LH: loop header
LB: loop body
LE: loop exit
PB: predicated region body
PF: predicated region fallthrough
CT: control target
= control target key end

     0   :  { %12 = vsyncpa [#allocation3], 0  ;;  %s1693_s0 = inlined_call_operand.hbm [shape: f32[256,128], index: 0, kind: input, shape index: {}]   ;;  %s1694_s1 = inlined_call_operand.hbm [shape: f32[128,128], index: 1, kind: input, shape index: {}]   ;;  %s1695_s2 = inlined_call_operand.vmem [shape: f32[1,128], index: 2, kind: input, shape index: {}]   ;;  %s1696_s3 = inlined_call_operand.hbm [shape: f32[128,128], index: 3, kind: input, shape index: {}]   ;;  %s1697_s4 = inlined_call_operand.vmem [shape: f32[1,128], index: 4, kind: input, shape index: {}]   ;;  %s1698_s5 = inlined_call_operand.hbm [shape: f32[256,128], index: 5, kind: output, shape index: {0}]   ;;  %s1699_s6 = inlined_call_operand.hbm [shape: f32[256,128], index: 6, kind: output, shape index: {1}]  }
   0x1   :  { %14 = vsyncpa [#allocation3 + $0x1], 0 }
   0x2   :  { %15 = vsyncpa [#allocation6], 0 }
   0x3   :  { %16 = vsyncpa [#allocation4], 0 }
   0x4   :  { %18 = vsyncpa [#allocation4 + $0x1], 0 }
   0x5   :  { %19 = vsyncpa [#allocation10], 0 }
   0x6   :  { %21 = vsyncpa [#allocation10 + $0x1], 0  ;;  %s1359_s21 = smov 0   ;;  %s1361_s22 = smov 0  }
   0x7   :  { %s1363_s23 = smov 0   ;;  %s1365_s24 = smov 0  }
   0x8 LB: > { %s1380_s25 = sadd.s32 4294967295, %s1313_s24   ;;  %s856_s26 = sadd.s32 4294967294, %s1313_s24   ;;  %s1313_s24 = sphi %s1365_s24, %s1724_s24   ;;  %s1309_s23 = sphi %s1363_s23, %s1723_s23   ;;  %s1305_s22 = sphi %s1361_s22, %s1722_s22   ;;  %s1301_s21 = sphi %s1359_s21, %s1721_s21  }
   0x9   : > { %p47_p0 = scmp.ne.s32.totalorder %s1305_s22, %s1301_s21  ;;  %p1700_p1 = scmp.eq.s32.totalorder %s1380_s25, 0 }
   0xa   : > { %p155_p2 = scmp.eq.s32.totalorder %s1380_s25, 1  ;;  %p161_p3 = scmp.eq.s32.totalorder %s856_s26, 1 }
   0xb   : > { %p1389_p4 = por %p1700_p1, %p47_p0  ;;  %p857_p5 = scmp.ge.s32.totalorder %s1313_s24, 1 }
   0xc   : > { %p1394_p6 = por %p161_p3, %p47_p0  ;;  %p194_p7 = scmp.lt.s32.totalorder %s1313_s24, 3 }
   0xd   : > { %s1706_s27 = scalar_select %p1389_p4, 1, 0 }
   0xe   : > { %s1707_s28 = scalar_select %p1394_p6, 1, 0 }
   0xf   : > { %p1399_p8 = pnand %p857_p5, %p194_p7  ;;  %s1315_s30 = smov [#allocation5]  }
  0x10   : > { %s206_s7 = sshll.u32 %s1315_s30, 4  ;;  %s1316_s9 = smov [#allocation7]   ;;  %s207_s7 = int_to_ptr.vmem [resolvable:$true] %s206_s7 }
  0x11   : > { %s1708_s29 = scalar_select %p1399_p8, 1, 0 }
  0x12   : > { %p1073_p9 = pneg %p1399_p8  ;;  %s222_s10 = sshll.u32 %s1316_s9, 4  ;;  %s223_s10 = int_to_ptr.vmem [resolvable:$true] %s222_s10 }
  0x13   : > { %s1146_s11 = scalar_lea.vmem %s207_s7, 2048  ;;  %p1154_p5 = scmp.lt.s32.totalorder %s207_s7, %s207_s7 }
  0x14   : > { %p1408_p11 = pnand %p1073_p9, %p1700_p1  ;;  %p1147_p13 = scmp.ne.s32.totalorder %s207_s7, %s1146_s11 }
  0x15   : > { %p1155_p7 = scmp.lt.s32.totalorder %s1146_s11, %s1146_s11 }
  0x16   : > { %p1137_p12 = pneg %p1408_p11 }
  0x17   : > { %p1156_p10 = por %p1155_p7, %p1154_p5 }
  0x18   : > { %p1149_p0 = pnand %p1147_p13, %p1137_p12 }
  0x1a   : > { %p1150_p3 = pneg %p1149_p0 }
  0x1c   : > { %p1157_p9 = pnand %p1156_p10, %p1150_p3 }
  0x1e   : > { %1160 = shalt.err (!%p1157_p9)
}
  0x1f   : > { %s1701_s12 = smov 128   ;;  %s1702_s13 = smov 8  }
  0x20   : > { %1076 = dma.hbm_to_vmem [thread:$0]  (!%p1408_p11), %s1694_s1, 2048, %s207_s7, [#allocation6], %s1701_s12, %s1701_s12, %s1702_s13  }
  0x21   : > { %s1172_s16 = scalar_lea.vmem %s223_s10, 2048  ;;  %p1180_p10 = scmp.lt.s32.totalorder %s223_s10, %s223_s10 }
  0x22   : > { %p1173_p13 = scmp.ne.s32.totalorder %s223_s10, %s1172_s16  ;;  %p1181_p3 = scmp.lt.s32.totalorder %s1172_s16, %s1172_s16 }
  0x24   : > { %p1175_p0 = pnand %p1173_p13, %p1137_p12  ;;  %p1182_p7 = por %p1181_p3, %p1180_p10 }
  0x26   : > { %p1176_p5 = pneg %p1175_p0 }
  0x28   : > { %p1183_p9 = pnand %p1182_p7, %p1176_p5 }
  0x2a   : > { %1186 = shalt.err (!%p1183_p9)
}
  0x2b   : > { %1079 = dma.hbm_to_vmem [thread:$0]  (!%p1408_p11), %s1696_s3, 2048, %s223_s10, [#allocation6], %s1701_s12, %s1701_s12, %s1702_s13  }
  0x2c   : > { %s1437_s19 = sadd.s32 1, %s1313_s24   ;;  %s34_s20 = sadd.s32 1, %s1309_s23 }
  0x2d   : > { %s31_s26 = ssub.s32 %s1313_s24, %s1437_s19  ;;  %p41_p12 = scmp.ne.s32.totalorder %s1309_s23, %s1305_s22 }
  0x2e   : > { %p32_p13 = scmp.eq.s32.totalorder %s31_s26, 0  ;;  %p42_p0 = scmp.eq.s32.totalorder %s1313_s24, 0 }
  0x2f   : > { %p1447_p5 = por %p155_p2, %p41_p12  ;;  %p1093_p10 = scmp.lt.s32.totalorder %s1313_s24, 2 }
  0x30   : > { %s1453_s7 = scalar_select %p32_p13, %s1309_s23, %s34_s20  }
  0x31   : > { %s1710_s30 = scalar_select %p1447_p5, 1, 0 }
  0x32   : > { %p43_p3 = por %p42_p0, %p41_p12  ;;  %s239_s8 = sand.u32 1, %s1309_s23  }
  0x33   : > { %s861_s9 = sshll.u32 %s239_s8, 7  ;;  %s880_s10 = sshll.u32 %s1313_s24, 11 }
  0x34   : > { %s1460_s15 = scalar_lea.hbm %s1693_s0, %s880_s10  ;;  %s243_s16 = scalar_lea.vmem [#allocation2], %s861_s9 }
  0x35   : > { %s250_s17 = sshll.u32 %s243_s16, 4  ;;  %p1464_p2 = pnand %p1093_p10, %p43_p3  ;;  %s1462_s17 = int_to_ptr.vmem [resolvable:$true] %s250_s17 }
  0x36   : > { %s1468_s20 = scalar_lea.sflag [#allocation3], %s239_s8  ;;  %s1187_s26 = scalar_lea.hbm %s1460_s15, 2048 }
  0x37   : > { %p1188_p11 = scmp.ne.s32.totalorder %s1460_s15, %s1187_s26  ;;  %p1189_p7 = pneg %p1464_p2 }
  0x38   : > { %s1192_s9 = scalar_lea.hbm %s1693_s0, 4096  ;;  %p1193_p13 = scmp.lt.s32.totalorder %s1460_s15, %s1693_s0 }
  0x39   : > { %p1190_p9 = pnand %p1189_p7, %p1188_p11  ;;  %p1194_p0 = scmp.lt.s32.totalorder %s1192_s9, %s1187_s26 }
  0x3b   : > { %p1191_p12 = pneg %p1190_p9  ;;  %p1195_p10 = por %p1194_p0, %p1193_p13 }
  0x3d   : > { %p1196_p3 = pnand %p1195_p10, %p1191_p12 }
  0x3f   : > { %1199 = shalt.err (!%p1196_p3)
}
  0x40   : > { %s1200_s8 = scalar_lea.vmem %s1462_s17, 2048  ;;  %s1319_s12 = smov [#allocation2]  }
  0x41   : > { %p1201_p1 = scmp.ne.s32.totalorder %s1462_s17, %s1200_s8  ;;  %s1205_s13 = sshll.u32 %s1319_s12, 4  ;;  %s1206_s13 = int_to_ptr.vmem [resolvable:$false] %s1205_s13 }
  0x42   : > { %s1207_s10 = scalar_lea.vmem %s1206_s13, 4096  ;;  %p1208_p9 = scmp.lt.s32.totalorder %s1462_s17, %s1206_s13 }
  0x43   : > { %p1203_p6 = pnand %p1201_p1, %p1189_p7  ;;  %p1209_p5 = scmp.lt.s32.totalorder %s1207_s10, %s1200_s8 }
  0x45   : > { %p1204_p11 = pneg %p1203_p6  ;;  %p1210_p4 = por %p1209_p5, %p1208_p9 }
  0x47   : > { %p1211_p8 = pnand %p1210_p4, %p1204_p11 }
  0x49   : > { %1214 = shalt.err (!%p1211_p8)
}
  0x4a   : > { %s1712_s26 = smov 8   ;;  %s1713_s11 = smov 128  }
  0x4b   : > { %1083 = dma.hbm_to_vmem [thread:$0]  (!%p1464_p2), %s1460_s15, 2048, %s1462_s17, %s1468_s20, %s1713_s11, %s1713_s11, %s1712_s26  }
  0x4c   : > { %p1714_p1 = scmp.ne.s32.totalorder %s1708_s29, 0 }
  0x4d   : > { %s1495_s12 = sand.u32 (!%p1714_p1), 1, %s1305_s22   ;;  %p1715_p4 = scmp.ne.s32.totalorder (!%p1714_p1), %s1706_s27, 0 }
  0x4e   : > { %262 = sbr.rel (%p1714_p1) target bundleno = 383 (0x17f), region = 40  ;;  %s1498_s13 = sshll.u32 (!%p1714_p1), %s1495_s12, 7 }
  0x4f   : > { %s265_s18 = scalar_lea.sflag (!%p1714_p1), [#allocation3], %s1495_s12  ;;  %s1502_s9 = scalar_lea.vmem (!%p1714_p1), [#allocation2], %s1498_s13 }
  0x53   : > { %1284 = dma.done.wait (%p1715_p4), %s265_s18, 2048  }
  0x54   : > { %1286 = vsyncadd (%p1715_p4), %s265_s18, 4294965248  ;;  %p1716_p6 = scmp.eq.s32.totalorder %s1380_s25, 0 }
  0x56   : > { %1288 = dma.done.wait (%p1716_p6), [#allocation6], 4096   ;;  %p1717_p8 = pmov %p1716_p6 }
  0x57   : > { %v344_v0 = vld [vmem:[#allocation5 + $0x78] sm:$0xff]  ;;  %v343_v2 = vld [vmem:[#allocation5 + $0x70] sm:$0xff]  ;;  %v342_v4 = vld [vmem:[#allocation5 + $0x68] sm:$0xff]  ;;  %s1541_s20 = scalar_lea.vmem [#allocation8], %s1498_s13  ;;  %s1545_s14 = scalar_lea.vmem [#allocation9], %s1498_s13 }
  0x58   : > { %1290 = vsyncadd (%p1717_p8), [#allocation6], 4294963200  ;;  %v528_v1 = vld [vmem:[#allocation7 + $0x78] sm:$0xff]  ;;  %947 = vmatprep.subr.mxu0 %v344_v0  ;;  %v527_v3 = vld [vmem:[#allocation7 + $0x70] sm:$0xff]  ;;  %s881_s16 = sshll.u32 %s1380_s25, 11  ;;  %s716_s8 = sshll.u32 %s1541_s20, 4  ;;  %s1610_s8 = int_to_ptr.vmem [resolvable:$true] %s716_s8 }
  0x59   : > { %1003 = vmatprep.subr.mxu1 %v528_v1  ;;  %948 = vmatpush3.msra.mxu0 %v344_v0  ;;  %v526_v5 = vld [vmem:[#allocation7 + $0x68] sm:$0xff]  ;;  %v341_v6 = vld [vmem:[#allocation5 + $0x60] sm:$0xff]  ;;  %v340_v8 = vld [vmem:[#allocation5 + $0x58] sm:$0xff]  ;;  %s1607_s26 = scalar_lea.hbm %s1698_s5, %s881_s16  ;;  %s732_s11 = sshll.u32 %s1545_s14, 4  ;;  %s1621_s11 = int_to_ptr.vmem [resolvable:$true] %s732_s11 }
  0x5a   : > { %1004 = vmatpush3.msra.mxu1 %v528_v1  ;;  %949 = vmatprep.subr.mxu0 %v343_v2  ;;  %v525_v7 = vld [vmem:[#allocation7 + $0x60] sm:$0xff]  ;;  %v524_v9 = vld [vmem:[#allocation7 + $0x58] sm:$0xff]  ;;  %v339_v10 = vld [vmem:[#allocation5 + $0x50] sm:$0xff]  ;;  %s698_s27 = scalar_lea.sflag [#allocation4], %s1495_s12  ;;  %s1215_s29 = scalar_lea.vmem %s1610_s8, 2048 }
  0x5b   : > { %1005 = vmatprep.subr.mxu1 %v527_v3  ;;  %950 = vmatpush3.msra.mxu0 %v343_v2  ;;  %v523_v11 = vld [vmem:[#allocation7 + $0x50] sm:$0xff]  ;;  %v338_v12 = vld [vmem:[#allocation5 + $0x48] sm:$0xff]  ;;  %v337_v14 = vld [vmem:[#allocation5 + $0x40] sm:$0xff]  ;;  %p1216_p5 = scmp.ne.s32.totalorder %s1610_s8, %s1215_s29  ;;  %p1718_p2 = scmp.ne.s32.totalorder %s1710_s30, 0 }
  0x5c   : > { %1006 = vmatpush3.msra.mxu1 %v527_v3  ;;  %951 = vmatprep.subr.mxu0 %v342_v4  ;;  %v522_v13 = vld [vmem:[#allocation7 + $0x48] sm:$0xff]  ;;  %v521_v15 = vld [vmem:[#allocation7 + $0x40] sm:$0xff]  ;;  %v336_v16 = vld [vmem:[#allocation5 + $0x38] sm:$0xff]  ;;  %s1320_s15 = smov [#allocation8]  }
  0x5d   : > { %1007 = vmatprep.subr.mxu1 %v526_v5  ;;  %952 = vmatpush3.msra.mxu0 %v342_v4  ;;  %v520_v17 = vld [vmem:[#allocation7 + $0x38] sm:$0xff]  ;;  %v335_v18 = vld [vmem:[#allocation5 + $0x30] sm:$0xff]  ;;  %v334_v20 = vld [vmem:[#allocation5 + $0x28] sm:$0xff]  ;;  %p1217_p7 = pnand %p1216_p5, %p1718_p2  ;;  %s1219_s17 = sshll.u32 %s1320_s15, 4  ;;  %s1220_s17 = int_to_ptr.vmem [resolvable:$false] %s1219_s17 }
  0x5e   : > { %1008 = vmatpush3.msra.mxu1 %v526_v5  ;;  %953 = vmatprep.subr.mxu0 %v341_v6  ;;  %v519_v19 = vld [vmem:[#allocation7 + $0x30] sm:$0xff]  ;;  %v518_v21 = vld [vmem:[#allocation7 + $0x28] sm:$0xff]  ;;  %v333_v22 = vld [vmem:[#allocation5 + $0x20] sm:$0xff]  ;;  %s1221_s25 = scalar_lea.vmem %s1220_s17, 4096  ;;  %p1222_p13 = scmp.lt.s32.totalorder %s1610_s8, %s1220_s17 }
  0x5f   : > { %1009 = vmatprep.subr.mxu1 %v525_v7  ;;  %954 = vmatpush3.msra.mxu0 %v341_v6  ;;  %v517_v23 = vld [vmem:[#allocation7 + $0x20] sm:$0xff]  ;;  %v332_v24 = vld [vmem:[#allocation5 + $0x18] sm:$0xff]  ;;  %v331_v26 = vld [vmem:[#allocation5 + $0x10] sm:$0xff]  ;;  %p1218_p12 = pneg %p1217_p7  ;;  %p1223_p0 = scmp.lt.s32.totalorder %s1221_s25, %s1215_s29 }
  0x60   : > { %1010 = vmatpush3.msra.mxu1 %v525_v7  ;;  %955 = vmatprep.subr.mxu0 %v340_v8  ;;  %v516_v25 = vld [vmem:[#allocation7 + $0x18] sm:$0xff]  ;;  %v515_v27 = vld [vmem:[#allocation7 + $0x10] sm:$0xff]  ;;  %v330_v28 = vld [vmem:[#allocation5 + $0x8] sm:$0xff] }
  0x61   : > { %1011 = vmatprep.subr.mxu1 %v524_v9  ;;  %956 = vmatpush3.msra.mxu0 %v340_v8  ;;  %v514_v29 = vld [vmem:[#allocation7 + $0x8] sm:$0xff]  ;;  %v329_v30 = vld [vmem:[#allocation5] sm:$0xff]  ;;  %v315_v34 = vld [vmem:[%s1502_s9 + $0x10] sm:$0xff]  ;;  %p1224_p10 = por %p1223_p0, %p1222_p13 }
  0x62   : > { %1012 = vmatpush3.msra.mxu1 %v524_v9  ;;  %957 = vmatprep.subr.mxu0 %v339_v10  ;;  %v513_v31 = vld [vmem:[#allocation7] sm:$0xff]  ;;  %v314_v33 = vld [vmem:[%s1502_s9 + $0x8] sm:$0xff]  ;;  %v316_v35 = vld [vmem:[%s1502_s9 + $0x18] sm:$0xff] }
  0x63   : > { %1013 = vmatprep.subr.mxu1 %v523_v11  ;;  %958 = vmatpush3.msra.mxu0 %v339_v10  ;;  %v313_v32 = vld [vmem:[%s1502_s9] sm:$0xff]  ;;  %v318_v37 = vld [vmem:[%s1502_s9 + $0x28] sm:$0xff]  ;;  %v319_v38 = vld [vmem:[%s1502_s9 + $0x30] sm:$0xff]  ;;  %p1225_p3 = pnand %p1224_p10, %p1218_p12 }
  0x64   : > { %1014 = vmatpush3.msra.mxu1 %v523_v11  ;;  %959 = vmatprep.subr.mxu0 %v338_v12  ;;  %v317_v36 = vld [vmem:[%s1502_s9 + $0x20] sm:$0xff]  ;;  %v320_v39 = vld [vmem:[%s1502_s9 + $0x38] sm:$0xff]  ;;  %v322_v41 = vld [vmem:[%s1502_s9 + $0x48] sm:$0xff] }
  0x65   : > { %1015 = vmatprep.subr.mxu1 %v522_v13  ;;  %960 = vmatpush3.msra.mxu0 %v338_v12  ;;  %v321_v40 = vld [vmem:[%s1502_s9 + $0x40] sm:$0xff]  ;;  %v323_v42 = vld [vmem:[%s1502_s9 + $0x50] sm:$0xff]  ;;  %v324_v43 = vld [vmem:[%s1502_s9 + $0x58] sm:$0xff] }
  0x66   : > { %1016 = vmatpush3.msra.mxu1 %v522_v13  ;;  %961 = vmatprep.subr.mxu0 %v337_v14  ;;  %v325_v44 = vld [vmem:[%s1502_s9 + $0x60] sm:$0xff]  ;;  %v326_v45 = vld [vmem:[%s1502_s9 + $0x68] sm:$0xff]  ;;  %v327_v46 = vld [vmem:[%s1502_s9 + $0x70] sm:$0xff] }
  0x67   : > { %1017 = vmatprep.subr.mxu1 %v521_v15  ;;  %962 = vmatpush3.msra.mxu0 %v337_v14  ;;  %v328_v47 = vld [vmem:[%s1502_s9 + $0x78] sm:$0xff]  ;;  %v1531_v48 = vld [vmem:[%s1695_s2] ss:$0 sm:$0xff]  ;;  %s1619_s9 = scalar_lea.hbm %s1699_s6, %s881_s16 }
  0x68   : > { %1018 = vmatpush3.msra.mxu1 %v521_v15  ;;  %963 = vmatprep.subr.mxu0 %v336_v16  ;;  %v1536_v49 = vld [vmem:[%s1697_s4] ss:$0 sm:$0xff] }
  0x69   : > { %1019 = vmatprep.subr.mxu1 %v520_v17  ;;  %964 = vmatpush3.msra.mxu0 %v336_v16 }
  0x6a   : > { %1020 = vmatpush3.msra.mxu1 %v520_v17  ;;  %965 = vmatprep.subr.mxu0 %v335_v18 }
  0x6b   : > { %1021 = vmatprep.subr.mxu1 %v519_v19  ;;  %966 = vmatpush3.msra.mxu0 %v335_v18 }
  0x6c   : > { %1022 = vmatpush3.msra.mxu1 %v519_v19  ;;  %967 = vmatprep.subr.mxu0 %v334_v20 }
  0x6d   : > { %1023 = vmatprep.subr.mxu1 %v518_v21  ;;  %968 = vmatpush3.msra.mxu0 %v334_v20 }
  0x6e   : > { %1024 = vmatpush3.msra.mxu1 %v518_v21  ;;  %969 = vmatprep.subr.mxu0 %v333_v22 }
  0x6f   : > { %1025 = vmatprep.subr.mxu1 %v517_v23  ;;  %970 = vmatpush3.msra.mxu0 %v333_v22 }
  0x70   : > { %1026 = vmatpush3.msra.mxu1 %v517_v23  ;;  %971 = vmatprep.subr.mxu0 %v332_v24 }
  0x71   : > { %1027 = vmatprep.subr.mxu1 %v516_v25  ;;  %972 = vmatpush3.msra.mxu0 %v332_v24 }
  0x72   : > { %1028 = vmatpush3.msra.mxu1 %v516_v25  ;;  %973 = vmatprep.subr.mxu0 %v331_v26 }
  0x73   : > { %1029 = vmatprep.subr.mxu1 %v515_v27  ;;  %974 = vmatpush3.msra.mxu0 %v331_v26 }
  0x74   : > { %1030 = vmatpush3.msra.mxu1 %v515_v27  ;;  %975 = vmatprep.subr.mxu0 %v330_v28 }
  0x75   : > { %1031 = vmatprep.subr.mxu1 %v514_v29  ;;  %976 = vmatpush3.msra.mxu0 %v330_v28 }
  0x76   : > { %1032 = vmatpush3.msra.mxu1 %v514_v29  ;;  %977 = vmatprep.subr.mxu0 %v329_v30 }
  0x77   : > { %1033 = vmatprep.subr.mxu1 %v513_v31  ;;  %978 = vmatpush3.msra.mxu0 %v329_v30 }
  0x78   : > { %979 = vmatprep.mubr.f32.mxu0 %v313_v32  ;;  %1034 = vmatpush3.msra.mxu1 %v513_v31 }
  0x79   : > { %1035 = vmatprep.mubr.f32.mxu1 %v313_v32  ;;  %980 = vmatmul.mubr.f32.vlgmr.msra.gmra.mxu0 %v314_v33 }
  0x7a   : > { %1036 = vmatmul.mubr.f32.vlgmr.msra.gmra.mxu1 %v314_v33  ;;  %982 = vmatprep.mubr.f32.mxu0 %v315_v34 }
  0x7b   : > { %1038 = vmatprep.mubr.f32.mxu1 %v315_v34 }
  0x7d   : > { %983 = vmatmul.mubr.f32.gmra.mxu0 %v316_v35 }
  0x7e   : > { %1039 = vmatmul.mubr.f32.gmra.mxu1 %v316_v35  ;;  %985 = vmatprep.mubr.f32.mxu0 %v317_v36 }
  0x7f   : > { %1041 = vmatprep.mubr.f32.mxu1 %v317_v36 }
  0x81   : > { %986 = vmatmul.mubr.f32.gmra.mxu0 %v318_v37 }
  0x82   : > { %1042 = vmatmul.mubr.f32.gmra.mxu1 %v318_v37  ;;  %988 = vmatprep.mubr.f32.mxu0 %v319_v38 }
  0x83   : > { %1044 = vmatprep.mubr.f32.mxu1 %v319_v38 }
  0x85   : > { %989 = vmatmul.mubr.f32.gmra.mxu0 %v320_v39 }
  0x86   : > { %1045 = vmatmul.mubr.f32.gmra.mxu1 %v320_v39  ;;  %991 = vmatprep.mubr.f32.mxu0 %v321_v40 }
  0x87   : > { %1047 = vmatprep.mubr.f32.mxu1 %v321_v40 }
  0x89   : > { %992 = vmatmul.mubr.f32.gmra.mxu0 %v322_v41 }
  0x8a   : > { %1048 = vmatmul.mubr.f32.gmra.mxu1 %v322_v41  ;;  %994 = vmatprep.mubr.f32.mxu0 %v323_v42 }
  0x8b   : > { %1050 = vmatprep.mubr.f32.mxu1 %v323_v42 }
  0x8d   : > { %995 = vmatmul.mubr.f32.gmra.mxu0 %v324_v43 }
  0x8e   : > { %1051 = vmatmul.mubr.f32.gmra.mxu1 %v324_v43  ;;  %997 = vmatprep.mubr.f32.mxu0 %v325_v44 }
  0x8f   : > { %1053 = vmatprep.mubr.f32.mxu1 %v325_v44 }
  0x91   : > { %998 = vmatmul.mubr.f32.gmra.mxu0 %v326_v45 }
  0x92   : > { %1054 = vmatmul.mubr.f32.gmra.mxu1 %v326_v45  ;;  %1000 = vmatprep.mubr.f32.mxu0 %v327_v46 }
  0x93   : > { %1056 = vmatprep.mubr.f32.mxu1 %v327_v46 }
  0x95   : > { %1001 = vmatmul.mubr.f32.gmra.mxu0 %v328_v47 }
  0x96   : > { %1057 = vmatmul.mubr.f32.gmra.mxu1 %v328_v47 }
 0x139   : > { %v981_v50 = vpop.f32.mrf.mxu0 }
 0x13a   : > { %v1037_v51 = vpop.f32.mrf.mxu1  ;;  %v424_v52 = vadd.f32 %v981_v50, %v1531_v48 }
 0x13b   : > { %v608_v53 = vadd.f32 %v1037_v51, %v1536_v49  ;;  %v418_v54 = vpop.f32.mrf.mxu0 }
 0x13c   : > { %v602_v55 = vpop.f32.mrf.mxu1  ;;  %498 = vst [vmem:[%s1541_s20 + $0x8] sm:$0xff] %v424_v52  ;;  %v419_v56 = vadd.f32 %v1531_v48, %v418_v54 }
 0x13d   : > { %682 = vst [vmem:[%s1545_s14 + $0x8] sm:$0xff] %v608_v53  ;;  %v603_v57 = vadd.f32 %v1536_v49, %v602_v55  ;;  %v984_v58 = vpop.f32.mrf.mxu0 }
 0x13e   : > { %v1040_v59 = vpop.f32.mrf.mxu1  ;;  %497 = vst [vmem:[%s1541_s20] sm:$0xff] %v419_v56  ;;  %v434_v60 = vadd.f32 %v984_v58, %v1531_v48 }
 0x13f   : > { %681 = vst [vmem:[%s1545_s14] sm:$0xff] %v603_v57  ;;  %v618_v61 = vadd.f32 %v1040_v59, %v1536_v49  ;;  %v428_v62 = vpop.f32.mrf.mxu0 }
 0x140   : > { %v612_v63 = vpop.f32.mrf.mxu1  ;;  %500 = vst [vmem:[%s1541_s20 + $0x18] sm:$0xff] %v434_v60  ;;  %v429_v0 = vadd.f32 %v1531_v48, %v428_v62 }
 0x141   : > { %684 = vst [vmem:[%s1545_s14 + $0x18] sm:$0xff] %v618_v61  ;;  %v613_v1 = vadd.f32 %v1536_v49, %v612_v63  ;;  %v987_v2 = vpop.f32.mrf.mxu0 }
 0x142   : > { %v1043_v3 = vpop.f32.mrf.mxu1  ;;  %499 = vst [vmem:[%s1541_s20 + $0x10] sm:$0xff] %v429_v0  ;;  %v444_v4 = vadd.f32 %v987_v2, %v1531_v48 }
 0x143   : > { %683 = vst [vmem:[%s1545_s14 + $0x10] sm:$0xff] %v613_v1  ;;  %v628_v5 = vadd.f32 %v1043_v3, %v1536_v49  ;;  %v438_v6 = vpop.f32.mrf.mxu0 }
 0x144   : > { %v622_v7 = vpop.f32.mrf.mxu1  ;;  %502 = vst [vmem:[%s1541_s20 + $0x28] sm:$0xff] %v444_v4  ;;  %v439_v8 = vadd.f32 %v1531_v48, %v438_v6 }
 0x145   : > { %686 = vst [vmem:[%s1545_s14 + $0x28] sm:$0xff] %v628_v5  ;;  %v623_v9 = vadd.f32 %v1536_v49, %v622_v7  ;;  %v990_v10 = vpop.f32.mrf.mxu0 }
 0x146   : > { %v1046_v11 = vpop.f32.mrf.mxu1  ;;  %501 = vst [vmem:[%s1541_s20 + $0x20] sm:$0xff] %v439_v8  ;;  %v454_v12 = vadd.f32 %v990_v10, %v1531_v48 }
 0x147   : > { %685 = vst [vmem:[%s1545_s14 + $0x20] sm:$0xff] %v623_v9  ;;  %v638_v13 = vadd.f32 %v1046_v11, %v1536_v49  ;;  %v448_v14 = vpop.f32.mrf.mxu0 }
 0x148   : > { %v632_v15 = vpop.f32.mrf.mxu1  ;;  %504 = vst [vmem:[%s1541_s20 + $0x38] sm:$0xff] %v454_v12  ;;  %v449_v16 = vadd.f32 %v1531_v48, %v448_v14 }
 0x149   : > { %688 = vst [vmem:[%s1545_s14 + $0x38] sm:$0xff] %v638_v13  ;;  %v633_v17 = vadd.f32 %v1536_v49, %v632_v15  ;;  %v993_v18 = vpop.f32.mrf.mxu0 }
 0x14a   : > { %v1049_v19 = vpop.f32.mrf.mxu1  ;;  %503 = vst [vmem:[%s1541_s20 + $0x30] sm:$0xff] %v449_v16  ;;  %v464_v20 = vadd.f32 %v993_v18, %v1531_v48 }
 0x14b   : > { %687 = vst [vmem:[%s1545_s14 + $0x30] sm:$0xff] %v633_v17  ;;  %v648_v21 = vadd.f32 %v1049_v19, %v1536_v49  ;;  %v458_v22 = vpop.f32.mrf.mxu0 }
 0x14c   : > { %v642_v23 = vpop.f32.mrf.mxu1  ;;  %506 = vst [vmem:[%s1541_s20 + $0x48] sm:$0xff] %v464_v20  ;;  %v459_v24 = vadd.f32 %v1531_v48, %v458_v22 }
 0x14d   : > { %690 = vst [vmem:[%s1545_s14 + $0x48] sm:$0xff] %v648_v21  ;;  %v643_v25 = vadd.f32 %v1536_v49, %v642_v23  ;;  %v996_v26 = vpop.f32.mrf.mxu0 }
 0x14e   : > { %v1052_v27 = vpop.f32.mrf.mxu1  ;;  %505 = vst [vmem:[%s1541_s20 + $0x40] sm:$0xff] %v459_v24  ;;  %v474_v28 = vadd.f32 %v996_v26, %v1531_v48 }
 0x14f   : > { %689 = vst [vmem:[%s1545_s14 + $0x40] sm:$0xff] %v643_v25  ;;  %v658_v29 = vadd.f32 %v1052_v27, %v1536_v49  ;;  %v468_v30 = vpop.f32.mrf.mxu0 }
 0x150   : > { %v652_v31 = vpop.f32.mrf.mxu1  ;;  %508 = vst [vmem:[%s1541_s20 + $0x58] sm:$0xff] %v474_v28  ;;  %v469_v32 = vadd.f32 %v1531_v48, %v468_v30 }
 0x151   : > { %692 = vst [vmem:[%s1545_s14 + $0x58] sm:$0xff] %v658_v29  ;;  %v653_v33 = vadd.f32 %v1536_v49, %v652_v31  ;;  %v999_v34 = vpop.f32.mrf.mxu0 }
 0x152   : > { %v1055_v35 = vpop.f32.mrf.mxu1  ;;  %507 = vst [vmem:[%s1541_s20 + $0x50] sm:$0xff] %v469_v32  ;;  %v484_v36 = vadd.f32 %v999_v34, %v1531_v48 }
 0x153   : > { %691 = vst [vmem:[%s1545_s14 + $0x50] sm:$0xff] %v653_v33  ;;  %v668_v37 = vadd.f32 %v1055_v35, %v1536_v49  ;;  %v478_v38 = vpop.f32.mrf.mxu0 }
 0x154   : > { %v662_v39 = vpop.f32.mrf.mxu1  ;;  %510 = vst [vmem:[%s1541_s20 + $0x68] sm:$0xff] %v484_v36  ;;  %v479_v40 = vadd.f32 %v1531_v48, %v478_v38 }
 0x155   : > { %694 = vst [vmem:[%s1545_s14 + $0x68] sm:$0xff] %v668_v37  ;;  %v663_v41 = vadd.f32 %v1536_v49, %v662_v39  ;;  %v1002_v42 = vpop.f32.mrf.mxu0 }
 0x156   : > { %v1058_v43 = vpop.f32.mrf.mxu1  ;;  %509 = vst [vmem:[%s1541_s20 + $0x60] sm:$0xff] %v479_v40  ;;  %v494_v44 = vadd.f32 %v1002_v42, %v1531_v48 }
 0x157   : > { %693 = vst [vmem:[%s1545_s14 + $0x60] sm:$0xff] %v663_v41  ;;  %v678_v45 = vadd.f32 %v1058_v43, %v1536_v49  ;;  %v488_v46 = vpop.f32.mrf.mxu0 }
 0x158   : > { %v672_v47 = vpop.f32.mrf.mxu1  ;;  %512 = vst [vmem:[%s1541_s20 + $0x78] sm:$0xff] %v494_v44  ;;  %v489_v50 = vadd.f32 %v1531_v48, %v488_v46 }
 0x159   : > { %696 = vst [vmem:[%s1545_s14 + $0x78] sm:$0xff] %v678_v45  ;;  %v673_v51 = vadd.f32 %v1536_v49, %v672_v47 }
 0x15a   : > { %511 = vst [vmem:[%s1541_s20 + $0x70] sm:$0xff] %v489_v50 }
 0x15b   : > { %695 = vst [vmem:[%s1545_s14 + $0x70] sm:$0xff] %v673_v51 }
 0x15c   : > { %1228 = shalt.err (!%p1225_p3)
}
 0x15d   : > { %s1229_s20 = scalar_lea.hbm %s1607_s26, 2048  ;;  %s1233_s10 = scalar_lea.hbm %s1698_s5, 4096 }
 0x15e   : > { %p1230_p11 = scmp.ne.s32.totalorder %s1607_s26, %s1229_s20  ;;  %p1234_p4 = scmp.lt.s32.totalorder %s1607_s26, %s1698_s5 }
 0x15f   : > { %p1235_p6 = scmp.lt.s32.totalorder %s1233_s10, %s1229_s20 }
 0x160   : > { %p1231_p9 = pnand %p1230_p11, %p1718_p2 }
 0x161   : > { %p1236_p8 = por %p1235_p6, %p1234_p4 }
 0x162   : > { %p1232_p1 = pneg %p1231_p9 }
 0x164   : > { %p1237_p5 = pnand %p1236_p8, %p1232_p1 }
 0x166   : > { %1240 = shalt.err (!%p1237_p5)
}
 0x167   : > { %s1321_s29 = smov 128   ;;  %s1322_s15 = smov 8  }
 0x168   : > { %1069 = dma.vmem_to_hbm [thread:$0]  (%p1718_p2), %s1610_s8, 2048, %s1607_s26, %s698_s27, %s1321_s29, %s1321_s29, %s1322_s15  }
 0x169   : > { %s703_s17 = scalar_lea.sflag [#allocation10], %s1495_s12  ;;  %s1241_s25 = scalar_lea.vmem %s1621_s11, 2048 }
 0x16a   : > { %p1242_p7 = scmp.ne.s32.totalorder %s1621_s11, %s1241_s25  ;;  %s1323_s20 = smov [#allocation9]  }
 0x16b   : > { %s1245_s14 = sshll.u32 %s1323_s20, 4  ;;  %s1246_s14 = int_to_ptr.vmem [resolvable:$false] %s1245_s14 }
 0x16c   : > { %p1243_p12 = pnand %p1242_p7, %p1718_p2  ;;  %s1247_s16 = scalar_lea.vmem %s1246_s14, 4096 }
 0x16d   : > { %p1248_p0 = scmp.lt.s32.totalorder %s1621_s11, %s1246_s14  ;;  %p1249_p10 = scmp.lt.s32.totalorder %s1247_s16, %s1241_s25 }
 0x16e   : > { %p1244_p13 = pneg %p1243_p12 }
 0x16f   : > { %p1250_p3 = por %p1249_p10, %p1248_p0 }
 0x171   : > { %p1251_p11 = pnand %p1250_p3, %p1244_p13 }
 0x173   : > { %1254 = shalt.err (!%p1251_p11)
}
 0x174   : > { %s1255_s8 = scalar_lea.hbm %s1619_s9, 2048  ;;  %s1259_s27 = scalar_lea.hbm %s1699_s6, 4096 }
 0x175   : > { %p1256_p9 = scmp.ne.s32.totalorder %s1619_s9, %s1255_s8  ;;  %p1260_p6 = scmp.lt.s32.totalorder %s1619_s9, %s1699_s6 }
 0x176   : > { %p1261_p8 = scmp.lt.s32.totalorder %s1259_s27, %s1255_s8 }
 0x177   : > { %p1257_p1 = pnand %p1256_p9, %p1718_p2 }
 0x178   : > { %p1262_p5 = por %p1261_p8, %p1260_p6 }
 0x179   : > { %p1258_p4 = pneg %p1257_p1 }
 0x17b   : > { %p1263_p7 = pnand %p1262_p5, %p1258_p4 }
 0x17d   : > { %1266 = shalt.err (!%p1263_p7)
}
 0x17e   : > { %1070 = dma.vmem_to_hbm [thread:$0]  (%p1718_p2), %s1621_s11, 2048, %s1619_s9, %s703_s17, %s1321_s29, %s1321_s29, %s1322_s15  }
 0x17f PF: > { %s747_s18 = sand.u32 1, %s1301_s21   ;;  %p1719_p12 = scmp.ne.s32.totalorder %s1707_s28, 0 }
 0x180   : > { %p1720_p13 = scmp.ge.s32.totalorder %s1313_s24, 2  ;;  %s748_s25 = scalar_lea.sflag [#allocation4], %s747_s18 }
 0x182   : > { %p1085_p0 = pnand %p1720_p13, %p1719_p12 }
 0x184   : > { %p1086_p10 = pneg %p1085_p0 }
 0x186   : > { %1292 = dma.done.wait (%p1086_p10), %s748_s25, 2048  }
 0x187   : > { %1294 = vsyncadd (%p1086_p10), %s748_s25, 4294965248  ;;  %s757_s20 = scalar_lea.sflag [#allocation10], %s747_s18 }
 0x188   : > { %1296 = dma.done.wait (%p1086_p10), %s757_s20, 2048  }
 0x189   : > { %1298 = vsyncadd (%p1086_p10), %s757_s20, 4294965248  ;;  %p24_p2 = scmp.ge.s32.totalorder %s1437_s19, 4   ;;  %s1721_s21 = smov %s1305_s22 }
 0x18a   : > { %s1722_s22 = smov %s1309_s23  ;;  %s1723_s23 = smov %s1453_s7 }
 0x18b   : > { %s1724_s24 = smov %s1437_s19  ;;  %26 = sbr.rel (!%p24_p2) target bundleno = 8 (0x8), region = 110 }
 0x190   :  { %762 = vsyncpa [#allocation3], 1 }
 0x191   :  { %764 = vsyncpa [#allocation3 + $0x1], 1 }
 0x192   :  { %765 = vsyncpa [#allocation6], 1 }
 0x193   :  { %766 = vsyncpa [#allocation4], 1 }
 0x194   :  { %768 = vsyncpa [#allocation4 + $0x1], 1 }
 0x195   :  { %769 = vsyncpa [#allocation10], 1 }
 0x196   :  { %771 = vsyncpa [#allocation10 + $0x1], 1 }

</bundles_post_ra>
